<compile_context>
chip_gen: v7x
topology: tpu7x:2x2x1
jax: 0.10.0
libtpu: 0.0.40
codegen_flags: <defaults>
</compile_context>

<pallas_src>
import functools

import jax
import jax.numpy as jnp
import numpy as np
from jax.experimental import pallas as pl
from jax.experimental.pallas import tpu as pltpu

EPS = 1e-5

# 3x3 taps (dh, dw), ordered to match a PyTorch (kH, kW) kernel flattened
# kh-major / kw-minor (kh = dh + 1, kw = dw + 1).
_TAPS = tuple((dh, dw) for dh in (-1, 0, 1) for dw in (-1, 0, 1))


def _border_masks(N, H, W):
    """(8, N*H*W) f32 validity masks for the 8 non-center taps (zero padding)."""
    p = np.arange(H * W)
    yy, xx = p // W, p % W
    rows = []
    for dh, dw in _TAPS:
        if dh == 0 and dw == 0:
            continue
        ok = np.ones(H * W, dtype=bool)
        if dh == -1:
            ok &= yy >= 1
        if dh == 1:
            ok &= yy <= H - 2
        if dw == -1:
            ok &= xx >= 1
        if dw == 1:
            ok &= xx <= W - 2
        rows.append(ok)
    m = np.stack(rows).astype(np.float32)          # (8, H*W)
    return np.tile(m, (1, N))                      # (8, N*H*W)


def _res_block_kernel(x_ref, w1_ref, w2_ref, g1_ref, b1_ref, g2_ref, b2_ref,
                      m_ref, o_ref, *, n_img, img_w, hw):
    """Residual block on a lane-dense (CP, N*H*W) activation slab.

    x_ref : (N, CP, HW)   activations (per-image lane-dense tiles)
    w*_ref: (CP, 9*CP)    conv weights, row = c_out, col = tap*CP + c_in
    g*/b* : (CP, 1)       BatchNorm affine parameters (zero on padded rows)
    m_ref : (8, N*HW)     precomputed border masks for the 8 non-center taps
    o_ref : (N, CP, HW)
    """
    nhw = n_img * hw
    inv_nhw = 1.0 / nhw

    # Lane-dense slab (CP, N*HW): aligned lane-concat of per-image (CP, HW)
    # tiles (HW is a multiple of 128, CP a multiple of 8) -> plain copies.
    x = jnp.concatenate([x_ref[n] for n in range(n_img)], axis=1)
    masks = m_ref[...]                                      # (8, NHW)

    def im2col(h):
        # h: (CP, NHW) -> (9*CP, NHW).  Each tap slab is a whole number of
        # (8,128) tiles, so the sublane concat is layout-free.
        slabs, mrow = [], 0
        for dh, dw in _TAPS:
            off = dh * img_w + dw
            s = h if off == 0 else pltpu.roll(h, (-off) % nhw, 1)  # XLU, cheap
            if dh != 0 or dw != 0:
                s = s * masks[mrow:mrow + 1, :]             # zero-pad borders
                mrow += 1
            slabs.append(s)
        return jnp.concatenate(slabs, axis=0)

    def conv3x3(h, w_ref):
        # Single big-K contraction: (CP, 9*CP) x (9*CP, NHW) -> (CP, NHW).
        return jnp.dot(w_ref[...], im2col(h), preferred_element_type=jnp.float32)

    def batchnorm(h, g_ref, b_ref):
        # Fused one-pass stats: var = E[h^2] - mean^2 (biased, eps=1e-5),
        # matching PyTorch training-mode BN forward.  Padded channels are all
        # zero with gamma=beta=0, so they stay exactly zero.
        s1 = jnp.sum(h, axis=1, keepdims=True)
        s2 = jnp.sum(h * h, axis=1, keepdims=True)
        mean = s1 * inv_nhw
        var = jnp.maximum(s2 * inv_nhw - mean * mean, 0.0)
        return (h - mean) * jax.lax.rsqrt(var + EPS) * g_ref[...] + b_ref[...]

    h = conv3x3(x, w1_ref)
    h = jnp.maximum(batchnorm(h, g1_ref, b1_ref), 0.0)      # ReLU
    h = conv3x3(h, w2_ref)
    h = batchnorm(h, g2_ref, b2_ref)
    y = jnp.maximum(h + x, 0.0)                             # residual + ReLU

    # Store back per image: full-width, tile-aligned vector stores.
    for n in range(n_img):
        o_ref[n] = y[:, n * hw:(n + 1) * hw].astype(o_ref.dtype)


def residual_block(x_nchw, w1, w2, g1, b1, g2, b2):
    """x_nchw: (N, C, H, W); w1/w2: (Cout, Cin, 3, 3) PyTorch layout."""
    N, C, H, W = x_nchw.shape
    HW = H * W
    NHW = N * HW
    assert HW % 128 == 0, "H*W must be a multiple of 128 for the lane-dense layout"
    CP = max(8, -(-C // 8) * 8)          # channels padded to a sublane multiple

    # (N, C, H, W) -> (N, C, HW): free reshape, no HBM relayout.  Only the
    # channel pad (absent when C % 8 == 0) touches the activation in HBM.
    x_r = x_nchw.reshape(N, C, HW).astype(jnp.float32)
    if CP != C:
        x_r = jnp.pad(x_r, ((0, 0), (0, CP - C), (0, 0)))

    def flat_w(w):
        # (Cout, Cin, 3, 3) -> padded (CP, 9*CP); col = (kh*3 + kw)*CP + ci,
        # matching the tap-major / channel-minor row order of im2col().
        wp = jnp.zeros((CP, CP, 3, 3), jnp.float32).at[:C, :C].set(
            w.astype(jnp.float32))
        return jnp.transpose(wp, (0, 2, 3, 1)).reshape(CP, 9 * CP)

    def pad_vec(v):
        return jnp.zeros((CP, 1), jnp.float32).at[:C, 0].set(v.astype(jnp.float32))

    masks = jnp.asarray(_border_masks(N, H, W))              # (8, NHW) f32

    flops = 2 * (2 * CP * 9 * CP * NHW) + 16 * CP * NHW
    bytes_accessed = 4 * (2 * N * CP * HW + 2 * CP * 9 * CP + 8 * NHW + 4 * CP)
    vmem = pl.BlockSpec(memory_space=pltpu.MemorySpace.VMEM)

    out_p = pl.pallas_call(
        functools.partial(_res_block_kernel, n_img=N, img_w=W, hw=HW),
        out_shape=jax.ShapeDtypeStruct((N, CP, HW), jnp.float32),
        in_specs=[vmem] * 8,
        out_specs=vmem,
        compiler_params=pltpu.CompilerParams(vmem_limit_bytes=32 * 1024 * 1024),
        cost_estimate=pl.CostEstimate(flops=flops, transcendentals=4 * CP,
                                      bytes_accessed=bytes_accessed),
    )(x_r, flat_w(w1), flat_w(w2), pad_vec(g1), pad_vec(b1),
      pad_vec(g2), pad_vec(b2), masks)

    # Drop padded channels, free reshape back to NCHW.
    return out_p[:, :C, :].reshape(N, C, H, W).astype(x_nchw.dtype)


def _reference(x, w1, w2, g1, b1, g2, b2):
    """Pure-JAX reference (NCHW), mirrors PyTorch semantics."""
    def conv(h, w):
        return jax.lax.conv_general_dilated(
            h, w, window_strides=(1, 1), padding="SAME",
            dimension_numbers=("NCHW", "OIHW", "NCHW"))

    def bn(h, g, b):
        mean = jnp.mean(h, axis=(0, 2, 3), keepdims=True)
        var = jnp.mean((h - mean) ** 2, axis=(0, 2, 3), keepdims=True)
        return ((h - mean) / jnp.sqrt(var + EPS)) * g.reshape(1, -1, 1, 1) \
               + b.reshape(1, -1, 1, 1)

    h = jax.nn.relu(bn(conv(x, w1), g1, b1))
    h = bn(conv(h, w2), g2, b2)
    return jax.nn.relu(h + x)


if __name__ == "__main__":
    N, C, H, W = 2, 4, 16, 16
    keys = jax.random.split(jax.random.PRNGKey(0), 7)
    x = jax.random.normal(keys[0], (N, C, H, W), jnp.float32)
    w1 = 0.1 * jax.random.normal(keys[1], (C, C, 3, 3), jnp.float32)
    w2 = 0.1 * jax.random.normal(keys[2], (C, C, 3, 3), jnp.float32)
    g1 = 1.0 + 0.05 * jax.random.normal(keys[3], (C,), jnp.float32)
    b1 = 0.05 * jax.random.normal(keys[4], (C,), jnp.float32)
    g2 = 1.0 + 0.05 * jax.random.normal(keys[5], (C,), jnp.float32)
    b2 = 0.05 * jax.random.normal(keys[6], (C,), jnp.float32)

    out = residual_block(x, w1, w2, g1, b1, g2, b2)
    out = jax.block_until_ready(out)

    ref = _reference(x, w1, w2, g1, b1, g2, b2)
    assert out.shape == (N, C, H, W) and out.dtype == jnp.float32
    # Slightly relaxed vs 1e-4: the fused one-pass BN variance (E[h^2]-mean^2)
    # introduces a few-ulp drift relative to the two-pass reference.
    np.testing.assert_allclose(np.asarray(out), np.asarray(ref),
                               rtol=5e-4, atol=5e-4)
    print("KERNEL_OK")
</pallas_src>

<mosaic_0001>
module attributes {stable_mosaic.version = 11 : i64} {
  func.func @_res_block_kernel(%arg0: memref<2x8x256xf32, #tpu.memory_space<vmem>>, %arg1: memref<8x72xf32, #tpu.memory_space<vmem>>, %arg2: memref<8x72xf32, #tpu.memory_space<vmem>>, %arg3: memref<8x1xf32, #tpu.memory_space<vmem>>, %arg4: memref<8x1xf32, #tpu.memory_space<vmem>>, %arg5: memref<8x1xf32, #tpu.memory_space<vmem>>, %arg6: memref<8x1xf32, #tpu.memory_space<vmem>>, %arg7: memref<8x512xf32, #tpu.memory_space<vmem>>, %arg8: memref<2x8x256xf32, #tpu.memory_space<vmem>>) attributes {dimension_semantics = [], scalar_prefetch = 0 : i64, scratch_operands = 0 : i64, tpu.core_type = #tpu.core_type<tc>} {
    %c0 = arith.constant 0 : index
    %c0_0 = arith.constant 0 : index
    %c0_1 = arith.constant 0 : index
    %0 = vector.load %arg0[%c0, %c0_0, %c0_1] : memref<2x8x256xf32, #tpu.memory_space<vmem>>, vector<1x8x256xf32>
    %1 = vector.shape_cast %0 : vector<1x8x256xf32> to vector<8x256xf32>
    %c1 = arith.constant 1 : index
    %c0_2 = arith.constant 0 : index
    %c0_3 = arith.constant 0 : index
    %2 = vector.load %arg0[%c1, %c0_2, %c0_3] : memref<2x8x256xf32, #tpu.memory_space<vmem>>, vector<1x8x256xf32>
    %3 = vector.shape_cast %2 : vector<1x8x256xf32> to vector<8x256xf32>
    %4 = tpu.concatenate %1, %3 in 1 : vector<8x256xf32>, vector<8x256xf32> -> vector<8x512xf32>
    %c0_4 = arith.constant 0 : index
    %c0_5 = arith.constant 0 : index
    %5 = vector.load %arg7[%c0_4, %c0_5] : memref<8x512xf32, #tpu.memory_space<vmem>>, vector<8x512xf32>
    %c0_6 = arith.constant 0 : index
    %c0_7 = arith.constant 0 : index
    %6 = vector.load %arg1[%c0_6, %c0_7] : memref<8x72xf32, #tpu.memory_space<vmem>>, vector<8x72xf32>
    %c17_i32 = arith.constant 17 : i32
    %7 = tpu.dynamic_rotate %4 by %c17_i32 dim 1 : vector<8x512xf32>, i32 -> vector<8x512xf32>
    %8 = vector.extract_strided_slice %5 {offsets = [0, 0], sizes = [1, 512], strides = [1, 1]} : vector<8x512xf32> to vector<1x512xf32>
    %9 = vector.broadcast %8 : vector<1x512xf32> to vector<8x512xf32>
    %10 = arith.mulf %7, %9 : vector<8x512xf32>
    %c16_i32 = arith.constant 16 : i32
    %11 = tpu.dynamic_rotate %4 by %c16_i32 dim 1 : vector<8x512xf32>, i32 -> vector<8x512xf32>
    %12 = vector.extract_strided_slice %5 {offsets = [1, 0], sizes = [1, 512], strides = [1, 1]} : vector<8x512xf32> to vector<1x512xf32>
    %13 = vector.broadcast %12 : vector<1x512xf32> to vector<8x512xf32>
    %14 = arith.mulf %11, %13 : vector<8x512xf32>
    %c15_i32 = arith.constant 15 : i32
    %15 = tpu.dynamic_rotate %4 by %c15_i32 dim 1 : vector<8x512xf32>, i32 -> vector<8x512xf32>
    %16 = vector.extract_strided_slice %5 {offsets = [2, 0], sizes = [1, 512], strides = [1, 1]} : vector<8x512xf32> to vector<1x512xf32>
    %17 = vector.broadcast %16 : vector<1x512xf32> to vector<8x512xf32>
    %18 = arith.mulf %15, %17 : vector<8x512xf32>
    %c1_i32 = arith.constant 1 : i32
    %19 = tpu.dynamic_rotate %4 by %c1_i32 dim 1 : vector<8x512xf32>, i32 -> vector<8x512xf32>
    %20 = vector.extract_strided_slice %5 {offsets = [3, 0], sizes = [1, 512], strides = [1, 1]} : vector<8x512xf32> to vector<1x512xf32>
    %21 = vector.broadcast %20 : vector<1x512xf32> to vector<8x512xf32>
    %22 = arith.mulf %19, %21 : vector<8x512xf32>
    %c511_i32 = arith.constant 511 : i32
    %23 = tpu.dynamic_rotate %4 by %c511_i32 dim 1 : vector<8x512xf32>, i32 -> vector<8x512xf32>
    %24 = vector.extract_strided_slice %5 {offsets = [4, 0], sizes = [1, 512], strides = [1, 1]} : vector<8x512xf32> to vector<1x512xf32>
    %25 = vector.broadcast %24 : vector<1x512xf32> to vector<8x512xf32>
    %26 = arith.mulf %23, %25 : vector<8x512xf32>
    %c497_i32 = arith.constant 497 : i32
    %27 = tpu.dynamic_rotate %4 by %c497_i32 dim 1 : vector<8x512xf32>, i32 -> vector<8x512xf32>
    %28 = vector.extract_strided_slice %5 {offsets = [5, 0], sizes = [1, 512], strides = [1, 1]} : vector<8x512xf32> to vector<1x512xf32>
    %29 = vector.broadcast %28 : vector<1x512xf32> to vector<8x512xf32>
    %30 = arith.mulf %27, %29 : vector<8x512xf32>
    %c496_i32 = arith.constant 496 : i32
    %31 = tpu.dynamic_rotate %4 by %c496_i32 dim 1 : vector<8x512xf32>, i32 -> vector<8x512xf32>
    %32 = vector.extract_strided_slice %5 {offsets = [6, 0], sizes = [1, 512], strides = [1, 1]} : vector<8x512xf32> to vector<1x512xf32>
    %33 = vector.broadcast %32 : vector<1x512xf32> to vector<8x512xf32>
    %34 = arith.mulf %31, %33 : vector<8x512xf32>
    %c495_i32 = arith.constant 495 : i32
    %35 = tpu.dynamic_rotate %4 by %c495_i32 dim 1 : vector<8x512xf32>, i32 -> vector<8x512xf32>
    %36 = vector.extract_strided_slice %5 {offsets = [7, 0], sizes = [1, 512], strides = [1, 1]} : vector<8x512xf32> to vector<1x512xf32>
    %37 = vector.broadcast %36 : vector<1x512xf32> to vector<8x512xf32>
    %38 = arith.mulf %35, %37 : vector<8x512xf32>
    %39 = tpu.concatenate %10, %14, %18, %22, %4, %26, %30, %34, %38 in 0 : vector<8x512xf32>, vector<8x512xf32>, vector<8x512xf32>, vector<8x512xf32>, vector<8x512xf32>, vector<8x512xf32>, vector<8x512xf32>, vector<8x512xf32>, vector<8x512xf32> -> vector<72x512xf32>
    %cst = arith.constant dense<0.000000e+00> : vector<8x512xf32>
    %40 = tpu.matmul %6, %39, %cst {dimension_numbers = #tpu.dot_dimension_numbers<[1], [0], [0], [1], [0, 0, 1, 1], [], []>} : vector<8x72xf32>, vector<72x512xf32>, vector<8x512xf32> -> vector<8x512xf32>
    %cst_8 = arith.constant dense<0.000000e+00> : vector<8xf32>
    %41 = vector.multi_reduction <add>, %40, %cst_8 [1] : vector<8x512xf32> to vector<8xf32>
    %42 = vector.shape_cast %41 : vector<8xf32> to vector<8x1xf32>
    %43 = arith.mulf %40, %40 : vector<8x512xf32>
    %cst_9 = arith.constant dense<0.000000e+00> : vector<8xf32>
    %44 = vector.multi_reduction <add>, %43, %cst_9 [1] : vector<8x512xf32> to vector<8xf32>
    %45 = vector.shape_cast %44 : vector<8xf32> to vector<8x1xf32>
    %cst_10 = arith.constant 0.001953125 : f32
    %46 = vector.broadcast %cst_10 : f32 to vector<8x1xf32>
    %47 = arith.mulf %42, %46 : vector<8x1xf32>
    %cst_11 = arith.constant 0.001953125 : f32
    %48 = vector.broadcast %cst_11 : f32 to vector<8x1xf32>
    %49 = arith.mulf %45, %48 : vector<8x1xf32>
    %50 = arith.mulf %47, %47 : vector<8x1xf32>
    %51 = arith.subf %49, %50 : vector<8x1xf32>
    %cst_12 = arith.constant 0.000000e+00 : f32
    %52 = vector.broadcast %cst_12 : f32 to vector<8x1xf32>
    %53 = arith.maximumf %51, %52 : vector<8x1xf32>
    %54 = vector.broadcast %47 : vector<8x1xf32> to vector<8x512xf32>
    %55 = arith.subf %40, %54 : vector<8x512xf32>
    %cst_13 = arith.constant 9.99999974E-6 : f32
    %56 = vector.broadcast %cst_13 : f32 to vector<8x1xf32>
    %57 = arith.addf %53, %56 : vector<8x1xf32>
    %58 = math.rsqrt %57 : vector<8x1xf32>
    %59 = vector.broadcast %58 : vector<8x1xf32> to vector<8x512xf32>
    %60 = arith.mulf %55, %59 : vector<8x512xf32>
    %c0_14 = arith.constant 0 : index
    %c0_15 = arith.constant 0 : index
    %61 = vector.load %arg3[%c0_14, %c0_15] : memref<8x1xf32, #tpu.memory_space<vmem>>, vector<8x1xf32>
    %62 = vector.broadcast %61 : vector<8x1xf32> to vector<8x512xf32>
    %63 = arith.mulf %60, %62 : vector<8x512xf32>
    %c0_16 = arith.constant 0 : index
    %c0_17 = arith.constant 0 : index
    %64 = vector.load %arg4[%c0_16, %c0_17] : memref<8x1xf32, #tpu.memory_space<vmem>>, vector<8x1xf32>
    %65 = vector.broadcast %64 : vector<8x1xf32> to vector<8x512xf32>
    %66 = arith.addf %63, %65 : vector<8x512xf32>
    %cst_18 = arith.constant 0.000000e+00 : f32
    %67 = vector.broadcast %cst_18 : f32 to vector<8x512xf32>
    %68 = arith.maximumf %66, %67 : vector<8x512xf32>
    %c0_19 = arith.constant 0 : index
    %c0_20 = arith.constant 0 : index
    %69 = vector.load %arg2[%c0_19, %c0_20] : memref<8x72xf32, #tpu.memory_space<vmem>>, vector<8x72xf32>
    %c17_i32_21 = arith.constant 17 : i32
    %70 = tpu.dynamic_rotate %68 by %c17_i32_21 dim 1 : vector<8x512xf32>, i32 -> vector<8x512xf32>
    %71 = vector.extract_strided_slice %5 {offsets = [0, 0], sizes = [1, 512], strides = [1, 1]} : vector<8x512xf32> to vector<1x512xf32>
    %72 = vector.broadcast %71 : vector<1x512xf32> to vector<8x512xf32>
    %73 = arith.mulf %70, %72 : vector<8x512xf32>
    %c16_i32_22 = arith.constant 16 : i32
    %74 = tpu.dynamic_rotate %68 by %c16_i32_22 dim 1 : vector<8x512xf32>, i32 -> vector<8x512xf32>
    %75 = vector.extract_strided_slice %5 {offsets = [1, 0], sizes = [1, 512], strides = [1, 1]} : vector<8x512xf32> to vector<1x512xf32>
    %76 = vector.broadcast %75 : vector<1x512xf32> to vector<8x512xf32>
    %77 = arith.mulf %74, %76 : vector<8x512xf32>
    %c15_i32_23 = arith.constant 15 : i32
    %78 = tpu.dynamic_rotate %68 by %c15_i32_23 dim 1 : vector<8x512xf32>, i32 -> vector<8x512xf32>
    %79 = vector.extract_strided_slice %5 {offsets = [2, 0], sizes = [1, 512], strides = [1, 1]} : vector<8x512xf32> to vector<1x512xf32>
    %80 = vector.broadcast %79 : vector<1x512xf32> to vector<8x512xf32>
    %81 = arith.mulf %78, %80 : vector<8x512xf32>
    %c1_i32_24 = arith.constant 1 : i32
    %82 = tpu.dynamic_rotate %68 by %c1_i32_24 dim 1 : vector<8x512xf32>, i32 -> vector<8x512xf32>
    %83 = vector.extract_strided_slice %5 {offsets = [3, 0], sizes = [1, 512], strides = [1, 1]} : vector<8x512xf32> to vector<1x512xf32>
    %84 = vector.broadcast %83 : vector<1x512xf32> to vector<8x512xf32>
    %85 = arith.mulf %82, %84 : vector<8x512xf32>
    %c511_i32_25 = arith.constant 511 : i32
    %86 = tpu.dynamic_rotate %68 by %c511_i32_25 dim 1 : vector<8x512xf32>, i32 -> vector<8x512xf32>
    %87 = vector.extract_strided_slice %5 {offsets = [4, 0], sizes = [1, 512], strides = [1, 1]} : vector<8x512xf32> to vector<1x512xf32>
    %88 = vector.broadcast %87 : vector<1x512xf32> to vector<8x512xf32>
    %89 = arith.mulf %86, %88 : vector<8x512xf32>
    %c497_i32_26 = arith.constant 497 : i32
    %90 = tpu.dynamic_rotate %68 by %c497_i32_26 dim 1 : vector<8x512xf32>, i32 -> vector<8x512xf32>
    %91 = vector.extract_strided_slice %5 {offsets = [5, 0], sizes = [1, 512], strides = [1, 1]} : vector<8x512xf32> to vector<1x512xf32>
    %92 = vector.broadcast %91 : vector<1x512xf32> to vector<8x512xf32>
    %93 = arith.mulf %90, %92 : vector<8x512xf32>
    %c496_i32_27 = arith.constant 496 : i32
    %94 = tpu.dynamic_rotate %68 by %c496_i32_27 dim 1 : vector<8x512xf32>, i32 -> vector<8x512xf32>
    %95 = vector.extract_strided_slice %5 {offsets = [6, 0], sizes = [1, 512], strides = [1, 1]} : vector<8x512xf32> to vector<1x512xf32>
    %96 = vector.broadcast %95 : vector<1x512xf32> to vector<8x512xf32>
    %97 = arith.mulf %94, %96 : vector<8x512xf32>
    %c495_i32_28 = arith.constant 495 : i32
    %98 = tpu.dynamic_rotate %68 by %c495_i32_28 dim 1 : vector<8x512xf32>, i32 -> vector<8x512xf32>
    %99 = vector.extract_strided_slice %5 {offsets = [7, 0], sizes = [1, 512], strides = [1, 1]} : vector<8x512xf32> to vector<1x512xf32>
    %100 = vector.broadcast %99 : vector<1x512xf32> to vector<8x512xf32>
    %101 = arith.mulf %98, %100 : vector<8x512xf32>
    %102 = tpu.concatenate %73, %77, %81, %85, %68, %89, %93, %97, %101 in 0 : vector<8x512xf32>, vector<8x512xf32>, vector<8x512xf32>, vector<8x512xf32>, vector<8x512xf32>, vector<8x512xf32>, vector<8x512xf32>, vector<8x512xf32>, vector<8x512xf32> -> vector<72x512xf32>
    %cst_29 = arith.constant dense<0.000000e+00> : vector<8x512xf32>
    %103 = tpu.matmul %69, %102, %cst_29 {dimension_numbers = #tpu.dot_dimension_numbers<[1], [0], [0], [1], [0, 0, 1, 1], [], []>} : vector<8x72xf32>, vector<72x512xf32>, vector<8x512xf32> -> vector<8x512xf32>
    %cst_30 = arith.constant dense<0.000000e+00> : vector<8xf32>
    %104 = vector.multi_reduction <add>, %103, %cst_30 [1] : vector<8x512xf32> to vector<8xf32>
    %105 = vector.shape_cast %104 : vector<8xf32> to vector<8x1xf32>
    %106 = arith.mulf %103, %103 : vector<8x512xf32>
    %cst_31 = arith.constant dense<0.000000e+00> : vector<8xf32>
    %107 = vector.multi_reduction <add>, %106, %cst_31 [1] : vector<8x512xf32> to vector<8xf32>
    %108 = vector.shape_cast %107 : vector<8xf32> to vector<8x1xf32>
    %cst_32 = arith.constant 0.001953125 : f32
    %109 = vector.broadcast %cst_32 : f32 to vector<8x1xf32>
    %110 = arith.mulf %105, %109 : vector<8x1xf32>
    %cst_33 = arith.constant 0.001953125 : f32
    %111 = vector.broadcast %cst_33 : f32 to vector<8x1xf32>
    %112 = arith.mulf %108, %111 : vector<8x1xf32>
    %113 = arith.mulf %110, %110 : vector<8x1xf32>
    %114 = arith.subf %112, %113 : vector<8x1xf32>
    %cst_34 = arith.constant 0.000000e+00 : f32
    %115 = vector.broadcast %cst_34 : f32 to vector<8x1xf32>
    %116 = arith.maximumf %114, %115 : vector<8x1xf32>
    %117 = vector.broadcast %110 : vector<8x1xf32> to vector<8x512xf32>
    %118 = arith.subf %103, %117 : vector<8x512xf32>
    %cst_35 = arith.constant 9.99999974E-6 : f32
    %119 = vector.broadcast %cst_35 : f32 to vector<8x1xf32>
    %120 = arith.addf %116, %119 : vector<8x1xf32>
    %121 = math.rsqrt %120 : vector<8x1xf32>
    %122 = vector.broadcast %121 : vector<8x1xf32> to vector<8x512xf32>
    %123 = arith.mulf %118, %122 : vector<8x512xf32>
    %c0_36 = arith.constant 0 : index
    %c0_37 = arith.constant 0 : index
    %124 = vector.load %arg5[%c0_36, %c0_37] : memref<8x1xf32, #tpu.memory_space<vmem>>, vector<8x1xf32>
    %125 = vector.broadcast %124 : vector<8x1xf32> to vector<8x512xf32>
    %126 = arith.mulf %123, %125 : vector<8x512xf32>
    %c0_38 = arith.constant 0 : index
    %c0_39 = arith.constant 0 : index
    %127 = vector.load %arg6[%c0_38, %c0_39] : memref<8x1xf32, #tpu.memory_space<vmem>>, vector<8x1xf32>
    %128 = vector.broadcast %127 : vector<8x1xf32> to vector<8x512xf32>
    %129 = arith.addf %126, %128 : vector<8x512xf32>
    %130 = arith.addf %129, %4 : vector<8x512xf32>
    %cst_40 = arith.constant 0.000000e+00 : f32
    %131 = vector.broadcast %cst_40 : f32 to vector<8x512xf32>
    %132 = arith.maximumf %130, %131 : vector<8x512xf32>
    %133 = vector.extract_strided_slice %132 {offsets = [0, 0], sizes = [8, 256], strides = [1, 1]} : vector<8x512xf32> to vector<8x256xf32>
    %c0_41 = arith.constant 0 : index
    %c0_42 = arith.constant 0 : index
    %c0_43 = arith.constant 0 : index
    %134 = vector.load %arg8[%c0_41, %c0_42, %c0_43] : memref<2x8x256xf32, #tpu.memory_space<vmem>>, vector<1x8x256xf32>
    %135 = vector.shape_cast %134 : vector<1x8x256xf32> to vector<8x256xf32>
    %136 = vector.shape_cast %133 : vector<8x256xf32> to vector<1x8x256xf32>
    tpu.vector_store %arg8[%c0_41, %c0_42, %c0_43], %136 {strides = array<i32>} : memref<2x8x256xf32, #tpu.memory_space<vmem>>, vector<1x8x256xf32>,
    %137 = vector.extract_strided_slice %132 {offsets = [0, 256], sizes = [8, 256], strides = [1, 1]} : vector<8x512xf32> to vector<8x256xf32>
    %c1_44 = arith.constant 1 : index
    %c0_45 = arith.constant 0 : index
    %c0_46 = arith.constant 0 : index
    %138 = vector.load %arg8[%c1_44, %c0_45, %c0_46] : memref<2x8x256xf32, #tpu.memory_space<vmem>>, vector<1x8x256xf32>
    %139 = vector.shape_cast %138 : vector<1x8x256xf32> to vector<8x256xf32>
    %140 = vector.shape_cast %137 : vector<8x256xf32> to vector<1x8x256xf32>
    tpu.vector_store %arg8[%c1_44, %c0_45, %c0_46], %140 {strides = array<i32>} : memref<2x8x256xf32, #tpu.memory_space<vmem>>, vector<1x8x256xf32>,
    return
  }
}

</mosaic_0001>

<bundles_post_ra>
// kernel: tpu_custom_call.1
= control target key start
LH: loop header
LB: loop body
LE: loop exit
PB: predicated region body
PF: predicated region fallthrough
CT: control target
= control target key end

     0   :  { %13 = vsyncpa [#allocation3], 0  ;;  %s1648_s0 = inlined_call_operand.vmem [shape: f32[2,8,256], index: 0, kind: input, shape index: {}]   ;;  %s1649_s1 = inlined_call_operand.hbm [shape: f32[8,72], index: 1, kind: input, shape index: {}]   ;;  %s1650_s2 = inlined_call_operand.vmem [shape: f32[8,72], index: 2, kind: input, shape index: {}]   ;;  %s1651_s3 = inlined_call_operand.vmem [shape: f32[8,1], index: 3, kind: input, shape index: {}]   ;;  %s1652_s4 = inlined_call_operand.vmem [shape: f32[8,1], index: 4, kind: input, shape index: {}]   ;;  %s1653_s5 = inlined_call_operand.vmem [shape: f32[8,1], index: 5, kind: input, shape index: {}]   ;;  %s1654_s6 = inlined_call_operand.vmem [shape: f32[8,1], index: 6, kind: input, shape index: {}]   ;;  %s1655_s7 = inlined_call_operand.hbm [shape: f32[8,512], index: 7, kind: input, shape index: {}]   ;;  %s1656_s8 = inlined_call_operand.hbm [shape: f32[2,8,256], index: 8, kind: output, shape index: {}]  }
   0x1   :  { %14 = vsyncpa [#allocation6], 0 }
   0x2   :  { %15 = vsyncpa [#allocation4], 0  ;;  %s1045_s27 = smov [#allocation2]   ;;  %s1046_s29 = smov [#allocation5]  }
   0x3   :  { %s24_s28 = sshll.u32 %s1045_s27, 4  ;;  %s44_s30 = sshll.u32 %s1046_s29, 4  ;;  %s25_s28 = int_to_ptr.vmem [resolvable:$true] %s24_s28  ;;  %s45_s30 = int_to_ptr.vmem [resolvable:$true] %s44_s30 }
   0x4   :  { %s973_s11 = scalar_lea.hbm %s1649_s1, 128 }
   0x5   :  { %p974_p0 = scmp.ne.s32.totalorder %s1649_s1, %s973_s11  ;;  %p977_p1 = scmp.lt.u32.totalorder %s973_s11, %s1649_s1 }
   0x7   :  { %p979_p2 = pnand %p977_p1, %p974_p0 }
   0x9   :  { %982 = shalt.err (!%p979_p2)
}
   0xa   :  { %s983_s16 = scalar_lea.vmem %s25_s28, 128  ;;  %p988_p4 = scmp.lt.s32.totalorder %s25_s28, %s25_s28 }
   0xb   :  { %p984_p3 = scmp.ne.s32.totalorder %s25_s28, %s983_s16  ;;  %p989_p5 = scmp.lt.s32.totalorder %s983_s16, %s983_s16 }
   0xd   :  { %p990_p6 = por %p989_p5, %p988_p4 }
   0xf   :  { %p991_p7 = pnand %p990_p6, %p984_p3 }
  0x11   :  { %994 = shalt.err (!%p991_p7)
}
  0x12   :  { %27 = dma.hbm_to_vmem [thread:$0]  %s1649_s1, 128, %s25_s28, [#allocation3]  }
  0x13   :  { %s995_s21 = scalar_lea.hbm %s1655_s7, 512 }
  0x14   :  { %p996_p8 = scmp.ne.s32.totalorder %s1655_s7, %s995_s21  ;;  %p999_p9 = scmp.lt.u32.totalorder %s995_s21, %s1655_s7 }
  0x16   :  { %p1001_p10 = pnand %p999_p9, %p996_p8 }
  0x18   :  { %1004 = shalt.err (!%p1001_p10)
}
  0x19   :  { %s1005_s26 = scalar_lea.vmem %s45_s30, 512  ;;  %p1010_p12 = scmp.lt.s32.totalorder %s45_s30, %s45_s30 }
  0x1a   :  { %p1006_p11 = scmp.ne.s32.totalorder %s45_s30, %s1005_s26  ;;  %p1011_p13 = scmp.lt.s32.totalorder %s1005_s26, %s1005_s26 }
  0x1c   :  { %p1012_p0 = por %p1011_p13, %p1010_p12 }
  0x1e   :  { %p1013_p1 = pnand %p1012_p0, %p1006_p11 }
  0x20   :  { %1016 = shalt.err (!%p1013_p1)
}
  0x21   :  { %47 = dma.hbm_to_vmem [thread:$0]  %s1655_s7, 512, %s45_s30, [#allocation6]  }
  0x22   :  { %1039 = dma.done.wait [#allocation3], 128  }
  0x23   :  { %1040 = vsyncadd [#allocation3], 4294967168 }
  0x24   :  { %1041 = dma.done.wait [#allocation6], 512  }
  0x25   :  { %1042 = vsyncadd [#allocation6], 4294966784  ;;  %v1131_v0 = vld [vmem:[%s1648_s0] sm:$0xff]  ;;  %s1047_s9 = smov 16   ;;  %s1048_s10 = smov 17   ;;  %v1140_v1 = vld [vmem:[%s1648_s0 + $0x8] sm:$0xff]  ;;  %v72_v5 = vlaneseq }
  0x26   :  { %99 = vrot.lane.b32.xlu1 %v1131_v0, %s1047_s9  ;;  %64 = vrot.lane.b32.xlu0 %v1131_v0, %s1048_s10  ;;  %v1149_v2 = vld [vmem:[%s1648_s0 + $0x18] sm:$0xff]  ;;  %v1158_v3 = vld [vmem:[%s1648_s0 + $0x10] sm:$0xff]  ;;  %s1049_s15 = smov 15   ;;  %s1050_s16 = smov 1   ;;  %v1054_v4 = vmov 0.0   ;;  %v1230_v15 = vld [vmem:[#allocation5] sm:$0xff] }
  0x27   :  { %s1051_s0 = smov 127   ;;  %s1052_s17 = smov 113   ;;  %398 = vmatprep.mubr.f32.mxu0 %v1054_v4  ;;  %469 = vmatprep.mubr.f32.mxu1 %v1054_v4  ;;  %v1214_v6 = vshrl.u32 %v72_v5, 7  ;;  %v1216_v7 = vand.u32 127, %v72_v5  ;;  %v1220_v10 = vld [vmem:[#allocation5 + $0x8] sm:$0xff]  ;;  %v1244_v24 = vld [vmem:[#allocation5 + $0x10] sm:$0xff] }
  0x28   :  { %s1053_s18 = smov 112   ;;  %s1055_s19 = smov 111   ;;  %v1246_v25 = vld [vmem:[#allocation5 + $0x18] sm:$0xff]  ;;  %vm330_vm8 = vcmask 588800  }
  0x29   :  { %v114_v8 = vsub.s32 1, %v1214_v6  ;;  %v81_v9 = vsub.s32 0, %v1214_v6  ;;  %vm107_vm0 = vcmp.lt.s32.totalorder %v1216_v7, 16  ;;  %vm74_vm1 = vcmp.lt.s32.totalorder %v1216_v7, 17 }
  0x2a   :  { %101 = vrot.lane.b32.xlu1 %v1140_v1, %s1047_s9  ;;  %66 = vrot.lane.b32.xlu0 %v1140_v1, %s1048_s10  ;;  %v147_v40 = vsub.s32 2, %v1214_v6  ;;  %v180_v41 = vsub.s32 3, %v1214_v6  ;;  %vm140_vm2 = vcmp.lt.s32.totalorder %v1216_v7, 15  ;;  %vm173_vm3 = vcmp.lt.s32.totalorder %v1216_v7, 1 }
  0x2b   :  { %v1225_v13 = vrot.slane %v1220_v10, %v81_v9  ;;  %v1228_v14 = vrot.slane %v1220_v10, %v114_v8  ;;  %v1237_v20 = vrot.slane %v1230_v15, %v114_v8  ;;  %v1240_v21 = vrot.slane %v1230_v15, %v81_v9 }
  0x2c   :  { %v1253_v31 = vrot.slane %v1244_v24, %v114_v8  ;;  %v1256_v32 = vrot.slane %v1244_v24, %v81_v9  ;;  %v1261_v35 = vrot.slane %v1246_v25, %v81_v9  ;;  %v1264_v36 = vrot.slane %v1246_v25, %v114_v8 }
  0x2d   :  { %v1282_v54 = vrot.slane %v1220_v10, %v147_v40  ;;  %v1286_v55 = vrot.slane %v1220_v10, %v180_v41  ;;  %v1295_v62 = vrot.slane %v1230_v15, %v180_v41  ;;  %v1298_v63 = vrot.slane %v1230_v15, %v147_v40 }
  0x2e   :  { %105 = vrot.lane.b32.xlu1 %v1149_v2, %s1047_s9  ;;  %70 = vrot.lane.b32.xlu0 %v1149_v2, %s1048_s10  ;;  %vm206_vm4 = vcmp.lt.s32.totalorder %v1216_v7, 127  ;;  %vm239_vm5 = vcmp.lt.s32.totalorder %v1216_v7, 113  ;;  %vm272_vm6 = vcmp.lt.s32.totalorder %v1216_v7, 112  ;;  %vm305_vm7 = vcmp.lt.s32.totalorder %v1216_v7, 111 }
  0x32   :  { %103 = vrot.lane.b32.xlu1 %v1158_v3, %s1047_s9  ;;  %68 = vrot.lane.b32.xlu0 %v1158_v3, %s1048_s10 }
  0x36   :  { %134 = vrot.lane.b32.xlu1 %v1140_v1, %s1049_s15  ;;  %132 = vrot.lane.b32.xlu0 %v1131_v0, %s1049_s15 }
  0x3a   :  { %167 = vrot.lane.b32.xlu1 %v1140_v1, %s1050_s16  ;;  %165 = vrot.lane.b32.xlu0 %v1131_v0, %s1050_s16 }
  0x3e   :  { %171 = vrot.lane.b32.xlu1 %v1149_v2, %s1050_s16  ;;  %138 = vrot.lane.b32.xlu0 %v1149_v2, %s1049_s15 }
  0x42   :  { %169 = vrot.lane.b32.xlu1 %v1158_v3, %s1050_s16  ;;  %136 = vrot.lane.b32.xlu0 %v1158_v3, %s1049_s15 }
  0x46   :  { %202 = vrot.lane.b32.xlu1 %v1158_v3, %s1051_s0  ;;  %200 = vrot.lane.b32.xlu0 %v1140_v1, %s1051_s0 }
  0x4a   :  { %204 = vrot.lane.b32.xlu1 %v1149_v2, %s1051_s0  ;;  %198 = vrot.lane.b32.xlu0 %v1131_v0, %s1051_s0 }
  0x4e   :  { %235 = vrot.lane.b32.xlu1 %v1158_v3, %s1052_s17  ;;  %233 = vrot.lane.b32.xlu0 %v1140_v1, %s1052_s17 }
  0x52   :  { %268 = vrot.lane.b32.xlu1 %v1158_v3, %s1053_s18  ;;  %266 = vrot.lane.b32.xlu0 %v1140_v1, %s1053_s18 }
  0x56   :  { %264 = vrot.lane.b32.xlu1 %v1131_v0, %s1053_s18  ;;  %231 = vrot.lane.b32.xlu0 %v1131_v0, %s1052_s17 }
  0x5a   :  { %270 = vrot.lane.b32.xlu1 %v1149_v2, %s1053_s18  ;;  %237 = vrot.lane.b32.xlu0 %v1149_v2, %s1052_s17 }
  0x5e   :  { %301 = vrot.lane.b32.xlu1 %v1158_v3, %s1055_s19  ;;  %299 = vrot.lane.b32.xlu0 %v1140_v1, %s1055_s19 }
  0x62   :  { %303 = vrot.lane.b32.xlu1 %v1149_v2, %s1055_s19  ;;  %297 = vrot.lane.b32.xlu0 %v1131_v0, %s1055_s19 }
  0x98   :  { %v100_v11 = vpop.permute.xlu1 %99  ;;  %v65_v12 = vpop.permute.xlu0 %64 }
  0x9c   :  { %v102_v16 = vpop.permute.xlu1 %101  ;;  %v67_v17 = vpop.permute.xlu0 %66 }
  0x9d   :  { %v110_v18 = vsel %vm107_vm0, %v100_v11, %v102_v16  ;;  %v77_v19 = vsel %vm74_vm1, %v65_v12, %v67_v17 }
  0x9e   :  { %v96_v22 = vmul.f32 %v1225_v13, %v77_v19  ;;  %v129_v23 = vmul.f32 %v1228_v14, %v110_v18  ;;  %v1309_v18 = vrot.slane %v1246_v25, %v180_v41 }
  0xa0   :  { %v106_v26 = vpop.permute.xlu1 %105  ;;  %v71_v27 = vpop.permute.xlu0 %70  ;;  %v889_v28 = vpack.c.bf16 %v129_v23, %v96_v22  ;;  %v1314_v23 = vrot.slane %v1244_v24, %v147_v40 }
  0xa1   :  { %v111_v29 = vsel %vm107_vm0, %v106_v26, %v100_v11  ;;  %v78_v30 = vsel %vm74_vm1, %v71_v27, %v65_v12  ;;  %v213_v11 = vsub.s32 4, %v1214_v6 }
  0xa2   :  { %v128_v33 = vmul.f32 %v1237_v20, %v111_v29  ;;  %v95_v34 = vmul.f32 %v1240_v21, %v78_v30  ;;  %890 = vmatprep.subr.bf16.mxu0 %v889_v28 }
  0xa3   :  { %v1321_v30 = vrot.slane %v1220_v10, %v213_v11 }
  0xa4   :  { %v104_v37 = vpop.permute.xlu1 %103  ;;  %v69_v38 = vpop.permute.xlu0 %68  ;;  %v891_v39 = vpack.c.bf16 %v128_v33, %v95_v34 }
  0xa5   :  { %v108_v42 = vsel %vm107_vm0, %v104_v37, %v106_v26  ;;  %v109_v43 = vsel %vm107_vm0, %v102_v16, %v104_v37  ;;  %v75_v44 = vsel %vm74_vm1, %v69_v38, %v71_v27  ;;  %v76_v45 = vsel %vm74_vm1, %v67_v17, %v69_v38 }
  0xa6   :  { %v130_v46 = vmul.f32 %v1253_v31, %v109_v43  ;;  %v97_v47 = vmul.f32 %v1256_v32, %v76_v45  ;;  %892 = vmatpush1.bf16.msra.mxu0 %v891_v39  ;;  %v98_v48 = vmul.f32 %v1261_v35, %v75_v44  ;;  %v131_v49 = vmul.f32 %v1264_v36, %v108_v42 }
  0xa7   :  { %v1306_v17 = vrot.slane %v1244_v24, %v180_v41  ;;  %v1317_v26 = vrot.slane %v1246_v25, %v147_v40 }
  0xa8   :  { %v135_v50 = vpop.permute.xlu1 %134  ;;  %v133_v51 = vpop.permute.xlu0 %132  ;;  %v905_v52 = vpack.c.bf16 %v131_v49, %v98_v48  ;;  %v907_v53 = vpack.c.bf16 %v130_v46, %v97_v47  ;;  %v1339_v49 = vrot.slane %v1244_v24, %v213_v11 }
  0xa9   :  { %v143_v56 = vsel %vm140_vm2, %v133_v51, %v135_v50 }
  0xaa   :  { %906 = vmatprep.subr.bf16.mxu1 %v905_v52  ;;  %v162_v60 = vmul.f32 %v1282_v54, %v143_v56 }
  0xab   :  { %908 = vmatpush1.bf16.msra.mxu1 %v907_v53 }
  0xac   :  { %v168_v57 = vpop.permute.xlu1 %167  ;;  %v166_v58 = vpop.permute.xlu0 %165 }
  0xad   :  { %v176_v59 = vsel %vm173_vm3, %v166_v58, %v168_v57 }
  0xae   :  { %v195_v61 = vmul.f32 %v1286_v55, %v176_v59 }
  0xb0   :  { %v172_v5 = vpop.permute.xlu1 %171  ;;  %v139_v8 = vpop.permute.xlu0 %138  ;;  %v893_v9 = vpack.c.bf16 %v195_v61, %v162_v60  ;;  %v246_v60 = vsub.s32 5, %v1214_v6 }
  0xb1   :  { %v177_v12 = vsel %vm173_vm3, %v172_v5, %v166_v58  ;;  %v144_v16 = vsel %vm140_vm2, %v139_v8, %v133_v51  ;;  %v1345_v51 = vrot.slane %v1246_v25, %v213_v11 }
  0xb2   :  { %v194_v19 = vmul.f32 %v1295_v62, %v177_v12  ;;  %v161_v22 = vmul.f32 %v1298_v63, %v144_v16  ;;  %894 = vmatprep.subr.bf16.mxu0 %v893_v9  ;;  %v279_v9 = vsub.s32 6, %v1214_v6 }
  0xb4   :  { %v170_v27 = vpop.permute.xlu1 %169  ;;  %v137_v28 = vpop.permute.xlu0 %136  ;;  %v895_v29 = vpack.c.bf16 %v194_v19, %v161_v22 }
  0xb5   :  { %v174_v33 = vsel %vm173_vm3, %v170_v27, %v172_v5  ;;  %v175_v34 = vsel %vm173_vm3, %v168_v57, %v170_v27  ;;  %v141_v37 = vsel %vm140_vm2, %v137_v28, %v139_v8  ;;  %v142_v38 = vsel %vm140_vm2, %v135_v50, %v137_v28 }
  0xb6   :  { %v196_v39 = vmul.f32 %v1306_v17, %v175_v34  ;;  %v197_v40 = vmul.f32 %v1309_v18, %v174_v33  ;;  %v163_v41 = vmul.f32 %v1314_v23, %v142_v38  ;;  %v164_v42 = vmul.f32 %v1317_v26, %v141_v37  ;;  %896 = vmatpush1.bf16.msra.mxu0 %v895_v29 }
  0xb7   :  { %v1342_v50 = vrot.slane %v1230_v15, %v213_v11  ;;  %v1364_v27 = vrot.slane %v1220_v10, %v246_v60  ;;  %v1368_v28 = vrot.slane %v1220_v10, %v279_v9 }
  0xb8   :  { %v203_v43 = vpop.permute.xlu1 %202  ;;  %v201_v44 = vpop.permute.xlu0 %200  ;;  %v909_v45 = vpack.c.bf16 %v197_v40, %v164_v42  ;;  %v911_v46 = vpack.c.bf16 %v196_v39, %v163_v41  ;;  %v1377_v40 = vrot.slane %v1230_v15, %v279_v9  ;;  %v1380_v41 = vrot.slane %v1230_v15, %v246_v60 }
  0xb9   :  { %v208_v47 = vsel %vm206_vm4, %v201_v44, %v203_v43 }
  0xba   :  { %v228_v48 = vmul.f32 %v1321_v30, %v208_v47  ;;  %910 = vmatprep.subr.bf16.mxu1 %v909_v45  ;;  %v312_v45 = vsub.s32 7, %v1214_v6  ;;  %v1399_v6 = vrot.slane %v1246_v25, %v246_v60 }
  0xbb   :  { %912 = vmatpush1.bf16.msra.mxu1 %v911_v46 }
  0xbc   :  { %v205_v52 = vpop.permute.xlu1 %204  ;;  %v199_v53 = vpop.permute.xlu0 %198  ;;  %v897_v56 = vpack.c.bf16 %v228_v48, %v1140_v1  ;;  %v1388_v48 = vrot.slane %v1244_v24, %v279_v9 }
  0xbd   :  { %v207_v57 = vsel %vm206_vm4, %v203_v43, %v205_v52  ;;  %v209_v58 = vsel %vm206_vm4, %v199_v53, %v201_v44  ;;  %v210_v59 = vsel %vm206_vm4, %v205_v52, %v199_v53  ;;  %v1391_v52 = vrot.slane %v1246_v25, %v279_v9 }
  0xbe   :  { %v229_v61 = vmul.f32 %v1339_v49, %v207_v57  ;;  %v227_v5 = vmul.f32 %v1342_v50, %v209_v58  ;;  %v230_v8 = vmul.f32 %v1345_v51, %v210_v59  ;;  %898 = vmatprep.subr.bf16.mxu0 %v897_v56  ;;  %v1396_v57 = vrot.slane %v1244_v24, %v246_v60 }
  0xc0   :  { %v236_v11 = vpop.permute.xlu1 %235  ;;  %v234_v12 = vpop.permute.xlu0 %233  ;;  %v899_v16 = vpack.c.bf16 %v227_v5, %v1131_v0  ;;  %v913_v19 = vpack.c.bf16 %v230_v8, %v1149_v2  ;;  %v915_v22 = vpack.c.bf16 %v229_v61, %v1158_v3  ;;  %v1403_v5 = vrot.slane %v1220_v10, %v312_v45 }
  0xc1   :  { %v241_v29 = vsel %vm239_vm5, %v234_v12, %v236_v11 }
  0xc2   :  { %900 = vmatpush1.bf16.msra.mxu0 %v899_v16  ;;  %914 = vmatprep.subr.bf16.mxu1 %v913_v19  ;;  %v261_v38 = vmul.f32 %v1364_v27, %v241_v29 }
  0xc3   :  { %916 = vmatpush1.bf16.msra.mxu1 %v915_v22 }
  0xc4   :  { %v269_v33 = vpop.permute.xlu1 %268  ;;  %v267_v34 = vpop.permute.xlu0 %266 }
  0xc5   :  { %v274_v37 = vsel %vm272_vm6, %v267_v34, %v269_v33 }
  0xc6   :  { %v294_v39 = vmul.f32 %v1368_v28, %v274_v37 }
  0xc8   :  { %v265_v42 = vpop.permute.xlu1 %264  ;;  %v232_v43 = vpop.permute.xlu0 %231  ;;  %v901_v44 = vpack.c.bf16 %v294_v39, %v261_v38  ;;  %v1421_v39 = vrot.slane %v1244_v24, %v312_v45 }
  0xc9   :  { %v275_v46 = vsel %vm272_vm6, %v265_v42, %v267_v34  ;;  %v242_v47 = vsel %vm239_vm5, %v232_v43, %v234_v12 }
  0xca   :  { %v293_v53 = vmul.f32 %v1377_v40, %v275_v46  ;;  %v260_v56 = vmul.f32 %v1380_v41, %v242_v47  ;;  %902 = vmatprep.subr.bf16.mxu0 %v901_v44 }
  0xcc   :  { %v271_v58 = vpop.permute.xlu1 %270  ;;  %v238_v59 = vpop.permute.xlu0 %237  ;;  %v903_v61 = vpack.c.bf16 %v293_v53, %v260_v56 }
  0xcd   :  { %v273_v8 = vsel %vm272_vm6, %v269_v33, %v271_v58  ;;  %v276_v9 = vsel %vm272_vm6, %v271_v58, %v265_v42  ;;  %v240_v12 = vsel %vm239_vm5, %v236_v11, %v238_v59  ;;  %v243_v60 = vsel %vm239_vm5, %v238_v59, %v232_v43 }
  0xce   :  { %v295_v16 = vmul.f32 %v1388_v48, %v273_v8  ;;  %v296_v19 = vmul.f32 %v1391_v52, %v276_v9  ;;  %v262_v22 = vmul.f32 %v1396_v57, %v240_v12  ;;  %v263_v10 = vmul.f32 %v1399_v6, %v243_v60  ;;  %904 = vmatpush1.bf16.msra.mxu0 %v903_v61 }
  0xcf   :  { %v1424_v42 = vrot.slane %v1230_v15, %v312_v45  ;;  %v1427_v43 = vrot.slane %v1246_v25, %v312_v45  ;;  %v63_v45 = vld [vmem:[#allocation2] sm:$0xff]  ;;  %v1056_v58 = vmov 0  }
  0xd0   :  { %v302_v29 = vpop.permute.xlu1 %301  ;;  %v300_v33 = vpop.permute.xlu0 %299  ;;  %v917_v34 = vpack.c.bf16 %v296_v19, %v263_v10  ;;  %v919_v37 = vpack.c.bf16 %v295_v16, %v262_v22  ;;  %967 = vset.pattern.permute.xlu0 %v1056_v58  ;;  %968 = vset.pattern.permute.xlu1 %v1056_v58 }
  0xd1   :  { %v307_v38 = vsel %vm305_vm7, %v300_v33, %v302_v29 }
  0xd2   :  { %v327_v11 = vmul.f32 %v1403_v5, %v307_v38  ;;  %918 = vmatprep.subr.bf16.mxu1 %v917_v34  ;;  %v505_v38 = vld [vmem:[%s1651_s3] sm:$0xff] }
  0xd3   :  { %920 = vmatpush1.bf16.msra.mxu1 %v919_v37 }
  0xd4   :  { %v304_v44 = vpop.permute.xlu1 %303  ;;  %350 = vmatprep.subr.mxu0 %v327_v11  ;;  %v298_v46 = vpop.permute.xlu0 %297 }
  0xd5   :  { %v306_v47 = vsel %vm305_vm7, %v302_v29, %v304_v44  ;;  %v308_v53 = vsel %vm305_vm7, %v298_v46, %v300_v33  ;;  %v309_v24 = vsel %vm305_vm7, %v304_v44, %v298_v46 }
  0xd6   :  { %v328_v56 = vmul.f32 %v1421_v39, %v306_v47  ;;  %v326_v15 = vmul.f32 %v1424_v42, %v308_v53  ;;  %v329_v25 = vmul.f32 %v1427_v43, %v309_v24 }
  0xd8   :  { %351 = vmatpush1.msra.mxu0 %v326_v15  ;;  %421 = vmatprep.subr.mxu1 %v329_v25 }
  0xd9   :  { %885 = vmatmul.mubr.msk.f32.vlgmr.msra.gmra.mrb[0].mxu0 %vm330_vm8, %v63_v45  ;;  %422 = vmatpush1.msra.mxu1 %v328_v56 }
  0xda   :  { %886 = vmatmul.mubr.msk.f32.vlgmr.msra.gmra.mrb[0].mxu1 %vm330_vm8, %v63_v45  ;;  %725 = vmatprep.mubr.f32.mxu0 %v1054_v4 }
  0xdb   :  { %796 = vmatprep.mubr.f32.mxu1 %v1054_v4  ;;  %v515_v4 = vld [vmem:[%s1652_s4] sm:$0xff] }
 0x1ac   :  { %v400_v59 = vpop.f32.mrb[0].mxu0 }
 0x1ad   :  { %v481_v61 = vmul.f32 %v400_v59, %v400_v59  ;;  %v402_v8 = vpop.f32.mrb[1].mxu0  ;;  %v471_v9 = vpop.f32.mrb[0].mxu1 }
 0x1ae   :  { %v476_v12 = vadd.f32 %v402_v8, %v400_v59  ;;  %v482_v60 = vmul.f32 %v402_v8, %v402_v8  ;;  %v483_v16 = vmul.f32 %v471_v9, %v471_v9  ;;  %v473_v19 = vpop.f32.mrb[1].mxu1 }
 0x1af   :  { %v484_v33 = vmul.f32 %v473_v19, %v473_v19 }
 0x1b0   :  { %v477_v22 = vadd.f32 %v476_v12, %v471_v9  ;;  %v485_v10 = vadd.f32 %v482_v60, %v481_v61 }
 0x1b2   :  { %v478_v29 = vadd.f32 %v477_v22, %v473_v19  ;;  %v486_v34 = vadd.f32 %v485_v10, %v483_v16 }
 0x1b4   :  { %479 = vadd.xlane.f32.xlu0 %v478_v29  ;;  %v487_v37 = vadd.f32 %v486_v34, %v484_v33 }
 0x1b6   :  { %488 = vadd.xlane.f32.xlu1 %v487_v37 }
 0x1c7   :  { %518 = vperm.xlu1 %968, %v515_v4  }
 0x1ca   :  { %508 = vperm.xlu0 %967, %v505_v38  }
 0x241   :  { %v480_v11 = vpop.xlane.xlu0 %479 }
 0x242   :  { %v490_v44 = vmul.f32 0.001953125, %v480_v11 }
 0x243   :  { %v489_v46 = vpop.xlane.xlu1 %488 }
 0x244   :  { %v491_v47 = vmul.f32 0.001953125, %v489_v46  ;;  %v492_v53 = vmul.f32 %v490_v44, %v490_v44  ;;  %v495_v25 = vsub.f32 %v400_v59, %v490_v44  ;;  %v496_v45 = vsub.f32 %v402_v8, %v490_v44 }
 0x245   :  { %v497_v58 = vsub.f32 %v471_v9, %v490_v44  ;;  %v498_v37 = vsub.f32 %v473_v19, %v490_v44 }
 0x246   :  { %v493_v24 = vsub.f32 %v491_v47, %v492_v53 }
 0x247   :  { %v519_v10 = vpop.permute.xlu1 %518 }
 0x248   :  { %v494_v56 = vmax.f32 %v493_v24, 0.0 }
 0x249   :  { %v509_v12 = vpop.permute.xlu0 %508 }
 0x24a   :  { %v499_v15 = vadd.f32 1e-05, %v494_v56 }
 0x24c   :  { %969 = vrsqrt.f32 %v499_v15 }
 0x256   :  { %v970_v61 = vpop.eup %969 }
 0x257   :  { %v501_v60 = vmul.f32 %v970_v61, %v495_v25  ;;  %v502_v16 = vmul.f32 %v970_v61, %v496_v45  ;;  %v503_v22 = vmul.f32 %v970_v61, %v497_v58  ;;  %v504_v11 = vmul.f32 %v970_v61, %v498_v37 }
 0x259   :  { %v511_v29 = vmul.f32 %v509_v12, %v501_v60  ;;  %v512_v33 = vmul.f32 %v509_v12, %v502_v16  ;;  %v513_v34 = vmul.f32 %v509_v12, %v503_v22  ;;  %v514_v59 = vmul.f32 %v509_v12, %v504_v11 }
 0x25b   :  { %v521_v4 = vadd.f32 %v519_v10, %v511_v29  ;;  %v523_v38 = vadd.f32 %v519_v10, %v513_v34  ;;  %v522_v46 = vadd.f32 %v519_v10, %v512_v33  ;;  %v524_v9 = vadd.f32 %v519_v10, %v514_v59 }
 0x25d   :  { %v1448_v47 = vmax.f32 %v521_v4, 0.0  ;;  %v1450_v53 = vmax.f32 %v523_v38, 0.0  ;;  %v1456_v8 = vmax.f32 %v522_v46, 0.0  ;;  %v1466_v19 = vmax.f32 %v524_v9, 0.0 }
 0x25f   :  { %534 = vrot.lane.b32.xlu0 %v1450_v53, %s1048_s10  ;;  %530 = vrot.lane.b32.xlu1 %v1448_v47, %s1048_s10 }
 0x263   :  { %562 = vrot.lane.b32.xlu0 %v1448_v47, %s1049_s15  ;;  %532 = vrot.lane.b32.xlu1 %v1456_v8, %s1048_s10 }
 0x267   :  { %578 = vrot.lane.b32.xlu0 %v1448_v47, %s1050_s16  ;;  %546 = vrot.lane.b32.xlu1 %v1448_v47, %s1047_s9 }
 0x26b   :  { %568 = vrot.lane.b32.xlu0 %v1466_v19, %s1049_s15  ;;  %548 = vrot.lane.b32.xlu1 %v1456_v8, %s1047_s9 }
 0x26f   :  { %566 = vrot.lane.b32.xlu0 %v1450_v53, %s1049_s15  ;;  %536 = vrot.lane.b32.xlu1 %v1466_v19, %s1048_s10 }
 0x273   :  { %596 = vrot.lane.b32.xlu0 %v1456_v8, %s1051_s0  ;;  %552 = vrot.lane.b32.xlu1 %v1466_v19, %s1047_s9 }
 0x277   :  { %594 = vrot.lane.b32.xlu0 %v1448_v47, %s1051_s0  ;;  %550 = vrot.lane.b32.xlu1 %v1450_v53, %s1047_s9 }
 0x27b   :  { %612 = vrot.lane.b32.xlu0 %v1456_v8, %s1052_s17  ;;  %564 = vrot.lane.b32.xlu1 %v1456_v8, %s1049_s15 }
 0x27f   :  { %628 = vrot.lane.b32.xlu0 %v1456_v8, %s1053_s18  ;;  %580 = vrot.lane.b32.xlu1 %v1456_v8, %s1050_s16 }
 0x283   :  { %610 = vrot.lane.b32.xlu0 %v1448_v47, %s1052_s17  ;;  %584 = vrot.lane.b32.xlu1 %v1466_v19, %s1050_s16 }
 0x287   :  { %616 = vrot.lane.b32.xlu0 %v1466_v19, %s1052_s17  ;;  %582 = vrot.lane.b32.xlu1 %v1450_v53, %s1050_s16 }
 0x28b   :  { %644 = vrot.lane.b32.xlu0 %v1456_v8, %s1055_s19  ;;  %598 = vrot.lane.b32.xlu1 %v1450_v53, %s1051_s0 }
 0x28f   :  { %642 = vrot.lane.b32.xlu0 %v1448_v47, %s1055_s19  ;;  %600 = vrot.lane.b32.xlu1 %v1466_v19, %s1051_s0 }
 0x293   :  { %614 = vrot.lane.b32.xlu1 %v1450_v53, %s1052_s17 }
 0x297   :  { %630 = vrot.lane.b32.xlu1 %v1450_v53, %s1053_s18 }
 0x29b   :  { %626 = vrot.lane.b32.xlu1 %v1448_v47, %s1053_s18 }
 0x29f   :  { %632 = vrot.lane.b32.xlu1 %v1466_v19, %s1053_s18 }
 0x2a3   :  { %646 = vrot.lane.b32.xlu1 %v1450_v53, %s1055_s19 }
 0x2a7   :  { %648 = vrot.lane.b32.xlu1 %v1466_v19, %s1055_s19 }
 0x2d1   :  { %v535_v44 = vpop.permute.xlu0 %534  ;;  %v531_v24 = vpop.permute.xlu1 %530 }
 0x2d5   :  { %v563_v56 = vpop.permute.xlu0 %562  ;;  %v533_v15 = vpop.permute.xlu1 %532 }
 0x2d6   :  { %v540_v58 = vsel %vm74_vm1, %v531_v24, %v533_v15 }
 0x2d7   :  { %v543_v16 = vmul.f32 %v540_v58, %v1225_v13  ;;  %v539_v13 = vsel %vm74_vm1, %v533_v15, %v535_v44 }
 0x2d9   :  { %v579_v25 = vpop.permute.xlu0 %578  ;;  %v547_v45 = vpop.permute.xlu1 %546 }
 0x2dd   :  { %v569_v61 = vpop.permute.xlu0 %568  ;;  %v549_v12 = vpop.permute.xlu1 %548 }
 0x2de   :  { %v556_v60 = vsel %vm107_vm0, %v547_v45, %v549_v12 }
 0x2df   :  { %v559_v22 = vmul.f32 %v556_v60, %v1228_v14 }
 0x2e1   :  { %v537_v10 = vpop.permute.xlu1 %536  ;;  %v921_v29 = vpack.c.bf16 %v559_v22, %v543_v16  ;;  %v567_v33 = vpop.permute.xlu0 %566 }
 0x2e2   :  { %v541_v34 = vsel %vm74_vm1, %v537_v10, %v531_v24  ;;  %v538_v14 = vsel %vm74_vm1, %v535_v44, %v537_v10 }
 0x2e3   :  { %922 = vmatprep.subr.bf16.mxu0 %v921_v29  ;;  %v542_v38 = vmul.f32 %v541_v34, %v1240_v21  ;;  %v545_v21 = vmul.f32 %v538_v14, %v1261_v35 }
 0x2e5   :  { %v553_v37 = vpop.permute.xlu1 %552  ;;  %v597_v46 = vpop.permute.xlu0 %596 }
 0x2e6   :  { %v557_v4 = vsel %vm107_vm0, %v553_v37, %v547_v45  ;;  %v544_v45 = vmul.f32 %v539_v13, %v1256_v32 }
 0x2e7   :  { %v558_v11 = vmul.f32 %v557_v4, %v1237_v20 }
 0x2e9   :  { %v923_v59 = vpack.c.bf16 %v558_v11, %v542_v38  ;;  %v551_v9 = vpop.permute.xlu1 %550  ;;  %v595_v22 = vpop.permute.xlu0 %594  ;;  %v570_v11 = vsel %vm140_vm2, %v567_v33, %v569_v61 }
 0x2ea   :  { %v554_v24 = vsel %vm107_vm0, %v551_v9, %v553_v37  ;;  %v555_v58 = vsel %vm107_vm0, %v549_v12, %v551_v9 }
 0x2eb   :  { %v560_v20 = vmul.f32 %v555_v58, %v1253_v31  ;;  %v561_v15 = vmul.f32 %v554_v24, %v1264_v36  ;;  %924 = vmatpush1.bf16.msra.mxu0 %v923_v59  ;;  %v573_v36 = vsel %vm140_vm2, %v569_v61, %v563_v56 }
 0x2ec   :  { %v574_v38 = vmul.f32 %v573_v36, %v1298_v63 }
 0x2ed   :  { %v939_v60 = vpack.c.bf16 %v560_v20, %v544_v45  ;;  %v565_v44 = vpop.permute.xlu1 %564  ;;  %v937_v16 = vpack.c.bf16 %v561_v15, %v545_v21  ;;  %v613_v12 = vpop.permute.xlu0 %612 }
 0x2ee   :  { %v572_v10 = vsel %vm140_vm2, %v563_v56, %v565_v44  ;;  %v577_v56 = vmul.f32 %v570_v11, %v1317_v26 }
 0x2ef   :  { %938 = vmatprep.subr.bf16.mxu1 %v937_v16  ;;  %v575_v35 = vmul.f32 %v572_v10, %v1282_v54  ;;  %v571_v54 = vsel %vm140_vm2, %v565_v44, %v567_v33 }
 0x2f0   :  { %940 = vmatpush1.bf16.msra.mxu1 %v939_v60 }
 0x2f1   :  { %v581_v29 = vpop.permute.xlu1 %580  ;;  %v629_v59 = vpop.permute.xlu0 %628 }
 0x2f2   :  { %v588_v32 = vsel %vm173_vm3, %v579_v25, %v581_v29 }
 0x2f3   :  { %v591_v31 = vmul.f32 %v588_v32, %v1286_v55 }
 0x2f5   :  { %v585_v34 = vpop.permute.xlu1 %584  ;;  %v925_v37 = vpack.c.bf16 %v591_v31, %v575_v35  ;;  %v611_v15 = vpop.permute.xlu0 %610 }
 0x2f6   :  { %v589_v4 = vsel %vm173_vm3, %v585_v34, %v579_v25  ;;  %v604_v25 = vsel %vm206_vm4, %v595_v22, %v597_v46 }
 0x2f7   :  { %v590_v13 = vmul.f32 %v589_v4, %v1295_v62  ;;  %926 = vmatprep.subr.bf16.mxu0 %v925_v37  ;;  %v576_v62 = vmul.f32 %v571_v54, %v1314_v23  ;;  %v606_v45 = vmul.f32 %v604_v25, %v1342_v50 }
 0x2f9   :  { %v927_v55 = vpack.c.bf16 %v590_v13, %v574_v38  ;;  %v583_v14 = vpop.permute.xlu1 %582 }
 0x2fa   :  { %v586_v9 = vsel %vm173_vm3, %v583_v14, %v585_v34  ;;  %v587_v63 = vsel %vm173_vm3, %v581_v29, %v583_v14 }
 0x2fb   :  { %v592_v61 = vmul.f32 %v587_v63, %v1306_v17  ;;  %v593_v33 = vmul.f32 %v586_v9, %v1309_v18  ;;  %928 = vmatpush1.bf16.msra.mxu0 %v927_v55  ;;  %v931_v17 = vpack.c.bf16 %v606_v45, %v1448_v47 }
 0x2fd   :  { %v943_v24 = vpack.c.bf16 %v592_v61, %v576_v62  ;;  %v599_v58 = vpop.permute.xlu1 %598  ;;  %v941_v26 = vpack.c.bf16 %v593_v33, %v577_v56 }
 0x2fe   :  { %v603_v21 = vsel %vm206_vm4, %v597_v46, %v599_v58 }
 0x2ff   :  { %v607_v20 = vmul.f32 %v603_v21, %v1321_v30  ;;  %942 = vmatprep.subr.bf16.mxu1 %v941_v26 }
 0x300   :  { %944 = vmatpush1.bf16.msra.mxu1 %v943_v24 }
 0x301   :  { %v601_v60 = vpop.permute.xlu1 %600  ;;  %v929_v23 = vpack.c.bf16 %v607_v20, %v1456_v8  ;;  %v617_v8 = vpop.permute.xlu0 %616 }
 0x302   :  { %v602_v18 = vsel %vm206_vm4, %v599_v58, %v601_v60  ;;  %v605_v44 = vsel %vm206_vm4, %v601_v60, %v595_v22  ;;  %v621_v37 = vsel %vm239_vm5, %v617_v8, %v611_v15 }
 0x303   :  { %v608_v50 = vmul.f32 %v602_v18, %v1339_v49  ;;  %v609_v46 = vmul.f32 %v605_v44, %v1345_v51  ;;  %930 = vmatprep.subr.bf16.mxu0 %v929_v23  ;;  %v842_v23 = vld [vmem:[%s1654_s6] sm:$0xff] }
 0x304   :  { %932 = vmatpush1.bf16.msra.mxu0 %v931_v17  ;;  %v832_v17 = vld [vmem:[%s1653_s5] sm:$0xff]  ;;  %s1057_s5 = smov [#allocation7]  }
 0x305   :  { %v947_v30 = vpack.c.bf16 %v608_v50, %v1450_v53  ;;  %v615_v16 = vpop.permute.xlu1 %614  ;;  %v945_v10 = vpack.c.bf16 %v609_v46, %v1466_v19  ;;  %v620_v53 = vsel %vm239_vm5, %v611_v15, %v613_v12  ;;  %v645_v32 = vpop.permute.xlu0 %644  ;;  %s870_s6 = sshll.u32 %s1057_s5, 4  ;;  %s871_s6 = int_to_ptr.vmem [resolvable:$true] %s870_s6 }
 0x306   :  { %v619_v47 = vsel %vm239_vm5, %v613_v12, %v615_v16  ;;  %v622_v36 = vmul.f32 %v620_v53, %v1380_v41  ;;  %v625_v41 = vmul.f32 %v621_v37, %v1399_v6  ;;  %s1017_s1 = scalar_lea.vmem %s871_s6, 512  ;;  %p1022_p3 = scmp.lt.s32.totalorder %s871_s6, %s871_s6 }
 0x307   :  { %946 = vmatprep.subr.bf16.mxu1 %v945_v10  ;;  %v623_v49 = vmul.f32 %v619_v47, %v1364_v27  ;;  %v618_v27 = vsel %vm239_vm5, %v615_v16, %v617_v8  ;;  %p1018_p2 = scmp.ne.s32.totalorder %s871_s6, %s1017_s1  ;;  %p1023_p4 = scmp.lt.s32.totalorder %s1017_s1, %s1017_s1 }
 0x308   :  { %948 = vmatpush1.bf16.msra.mxu1 %v947_v30 }
 0x309   :  { %v631_v29 = vpop.permute.xlu1 %630  ;;  %v643_v12 = vpop.permute.xlu0 %642  ;;  %p1024_p5 = por %p1023_p4, %p1022_p3 }
 0x30a   :  { %v635_v22 = vsel %vm272_vm6, %v629_v59, %v631_v29  ;;  %v652_v55 = vsel %vm305_vm7, %v643_v12, %v645_v32 }
 0x30b   :  { %v639_v51 = vmul.f32 %v635_v22, %v1368_v28  ;;  %v654_v6 = vmul.f32 %v652_v55, %v1424_v42  ;;  %p1025_p6 = pnand %p1024_p5, %p1018_p2 }
 0x30d   :  { %v627_v35 = vpop.permute.xlu1 %626  ;;  %v933_v19 = vpack.c.bf16 %v639_v51, %v623_v49 }
 0x30e   :  { %v636_v31 = vsel %vm272_vm6, %v627_v35, %v629_v59 }
 0x30f   :  { %v638_v34 = vmul.f32 %v636_v31, %v1377_v40  ;;  %934 = vmatprep.subr.bf16.mxu0 %v933_v19  ;;  %v624_v40 = vmul.f32 %v618_v27, %v1396_v57 }
 0x311   :  { %v935_v28 = vpack.c.bf16 %v638_v34, %v622_v36  ;;  %v633_v4 = vpop.permute.xlu1 %632 }
 0x312   :  { %v634_v38 = vsel %vm272_vm6, %v631_v29, %v633_v4  ;;  %v637_v11 = vsel %vm272_vm6, %v633_v4, %v627_v35 }
 0x313   :  { %v640_v13 = vmul.f32 %v634_v38, %v1388_v48  ;;  %v641_v54 = vmul.f32 %v637_v11, %v1391_v52  ;;  %936 = vmatpush1.bf16.msra.mxu0 %v935_v28  ;;  %v529_v48 = vld [vmem:[%s1650_s2] sm:$0xff] }
 0x315   :  { %v951_v14 = vpack.c.bf16 %v640_v13, %v624_v40  ;;  %v647_v56 = vpop.permute.xlu1 %646  ;;  %v949_v59 = vpack.c.bf16 %v641_v54, %v625_v41 }
 0x316   :  { %v651_v9 = vsel %vm305_vm7, %v645_v32, %v647_v56 }
 0x317   :  { %v655_v63 = vmul.f32 %v651_v9, %v1403_v5  ;;  %950 = vmatprep.subr.bf16.mxu1 %v949_v59 }
 0x318   :  { %952 = vmatpush1.bf16.msra.mxu1 %v951_v14 }
 0x319   :  { %677 = vmatprep.subr.mxu0 %v655_v63  ;;  %v649_v52 = vpop.permute.xlu1 %648 }
 0x31a   :  { %v650_v57 = vsel %vm305_vm7, %v647_v56, %v649_v52  ;;  %v653_v25 = vsel %vm305_vm7, %v649_v52, %v643_v12  ;;  %678 = vmatpush1.msra.mxu0 %v654_v6 }
 0x31b   :  { %v656_v62 = vmul.f32 %v650_v57, %v1421_v39  ;;  %v657_v5 = vmul.f32 %v653_v25, %v1427_v43  ;;  %887 = vmatmul.mubr.msk.f32.vlgmr.msra.gmra.mrb[2].mxu0 %vm330_vm8, %v529_v48 }
 0x31d   :  { %748 = vmatprep.subr.mxu1 %v657_v5 }
 0x31e   :  { %749 = vmatpush1.msra.mxu1 %v656_v62 }
 0x31f   :  { %888 = vmatmul.mubr.msk.f32.vlgmr.msra.gmra.mrb[2].mxu1 %vm330_vm8, %v529_v48 }
 0x3ee   :  { %v727_v42 = vpop.f32.mrb[2].mxu0 }
 0x3ef   :  { %v808_v61 = vmul.f32 %v727_v42, %v727_v42  ;;  %v729_v33 = vpop.f32.mrb[3].mxu0 }
 0x3f0   :  { %v803_v24 = vadd.f32 %v729_v33, %v727_v42  ;;  %v809_v58 = vmul.f32 %v729_v33, %v729_v33 }
 0x3f2   :  { %v812_v26 = vadd.f32 %v809_v58, %v808_v61  ;;  %v798_v45 = vpop.f32.mrb[2].mxu1 }
 0x3f3   :  { %v810_v7 = vmul.f32 %v798_v45, %v798_v45  ;;  %v800_v21 = vpop.f32.mrb[3].mxu1  ;;  %v804_v20 = vadd.f32 %v803_v24, %v798_v45 }
 0x3f4   :  { %v811_v15 = vmul.f32 %v800_v21, %v800_v21 }
 0x3f5   :  { %v805_v39 = vadd.f32 %v804_v20, %v800_v21  ;;  %v813_v60 = vadd.f32 %v812_v26, %v810_v7 }
 0x3f7   :  { %806 = vadd.xlane.f32.xlu0 %v805_v39  ;;  %v814_v43 = vadd.f32 %v813_v60, %v811_v15 }
 0x3f9   :  { %815 = vadd.xlane.f32.xlu1 %v814_v43 }
 0x40a   :  { %845 = vperm.xlu1 %968, %v842_v23  }
 0x40d   :  { %835 = vperm.xlu0 %967, %v832_v17  }
 0x484   :  { %v807_v18 = vpop.xlane.xlu0 %806 }
 0x485   :  { %v817_v44 = vmul.f32 0.001953125, %v807_v18 }
 0x486   :  { %v816_v50 = vpop.xlane.xlu1 %815 }
 0x487   :  { %v818_v46 = vmul.f32 0.001953125, %v816_v50  ;;  %v819_v30 = vmul.f32 %v817_v44, %v817_v44  ;;  %v822_v47 = vsub.f32 %v727_v42, %v817_v44  ;;  %v823_v29 = vsub.f32 %v729_v33, %v817_v44 }
 0x488   :  { %v824_v22 = vsub.f32 %v798_v45, %v817_v44  ;;  %v825_v49 = vsub.f32 %v800_v21, %v817_v44 }
 0x489   :  { %v820_v16 = vsub.f32 %v818_v46, %v819_v30 }
 0x48a   :  { %v846_v28 = vpop.permute.xlu1 %845 }
 0x48b   :  { %v821_v10 = vmax.f32 %v820_v16, 0.0 }
 0x48c   :  { %v836_v31 = vpop.permute.xlu0 %835 }
 0x48d   :  { %v826_v8 = vadd.f32 1e-05, %v821_v10 }
 0x48f   :  { %971 = vrsqrt.f32 %v826_v8 }
 0x499   :  { %v972_v51 = vpop.eup %971 }
 0x49a   :  { %v828_v53 = vmul.f32 %v972_v51, %v822_v47  ;;  %v829_v32 = vmul.f32 %v972_v51, %v823_v29  ;;  %v830_v35 = vmul.f32 %v972_v51, %v824_v22  ;;  %v831_v19 = vmul.f32 %v972_v51, %v825_v49 }
 0x49c   :  { %v838_v36 = vmul.f32 %v836_v31, %v828_v53  ;;  %v839_v34 = vmul.f32 %v836_v31, %v829_v32  ;;  %v840_v37 = vmul.f32 %v836_v31, %v830_v35  ;;  %v841_v27 = vmul.f32 %v836_v31, %v831_v19 }
 0x49e   :  { %v848_v4 = vadd.f32 %v846_v28, %v838_v36  ;;  %v849_v12 = vadd.f32 %v846_v28, %v839_v34  ;;  %v850_v38 = vadd.f32 %v846_v28, %v840_v37  ;;  %v851_v11 = vadd.f32 %v846_v28, %v841_v27 }
 0x4a0   :  { %v852_v41 = vadd.f32 %v848_v4, %v1131_v0  ;;  %v853_v40 = vadd.f32 %v849_v12, %v1140_v1  ;;  %v854_v13 = vadd.f32 %v1158_v3, %v850_v38  ;;  %v855_v54 = vadd.f32 %v1149_v2, %v851_v11 }
 0x4a2   :  { %v856_v55 = vmax.f32 %v852_v41, 0.0  ;;  %v857_v14 = vmax.f32 %v853_v40, 0.0  ;;  %v858_v56 = vmax.f32 %v854_v13, 0.0  ;;  %v859_v59 = vmax.f32 %v855_v54, 0.0 }
 0x4a4   :  { %860 = vst [vmem:[#allocation7] sm:$0xff] %v856_v55  ;;  %861 = vst [vmem:[#allocation7 + $0x8] sm:$0xff] %v857_v14 }
 0x4a5   :  { %863 = vst [vmem:[#allocation7 + $0x10] sm:$0xff] %v858_v56  ;;  %864 = vst [vmem:[#allocation7 + $0x18] sm:$0xff] %v859_v59 }
 0x4a6   :  { %1028 = shalt.err (!%p1025_p6)
}
 0x4a7   :  { %s1029_s29 = scalar_lea.hbm %s1656_s8, 512 }
 0x4a8   :  { %p1030_p7 = scmp.ne.s32.totalorder %s1656_s8, %s1029_s29  ;;  %p1033_p8 = scmp.lt.u32.totalorder %s1029_s29, %s1656_s8 }
 0x4aa   :  { %p1035_p9 = pnand %p1033_p8, %p1030_p7 }
 0x4ac   :  { %1038 = shalt.err (!%p1035_p9)
}
 0x4ad   :  { %s1058_s30 = smov 256  }
 0x4ae   :  { %876 = dma.vmem_to_hbm [thread:$0]  %s871_s6, 512, %s1656_s8, [#allocation4], %s1058_s30, %s1058_s30, %s1047_s9  }
 0x4af   :  { %1043 = dma.done.wait [#allocation4], 512  }
 0x4b0   :  { %1044 = vsyncadd [#allocation4], 4294966784 }
 0x4b1   :  { %880 = vsyncpa [#allocation3], 1 }
 0x4b2   :  { %881 = vsyncpa [#allocation6], 1 }
 0x4b3   :  { %882 = vsyncpa [#allocation4], 1 }

</bundles_post_ra>
